<compile_context>
chip_gen: v7x
topology: tpu7x:2x2x1
jax: 0.10.0
libtpu: 0.0.40
codegen_flags: <defaults>
</compile_context>

<pallas_src>
import functools

import jax
import jax.numpy as jnp
from jax.experimental import pallas as pl
from jax.experimental.pallas import tpu as pltpu

GAMMA = 2.0
ALPHA = 0.25
_LANE = 128


def _focal_loss_kernel(x_ref, t_ref, w_ref, o_ref, *, gamma, alpha):
    x = x_ref[...].astype(jnp.float32)   # logits
    t = t_ref[...].astype(jnp.float32)   # one-hot targets (may arrive bf16)
    w = w_ref[...].astype(jnp.float32)   # anchor weights

    # Shared exp(-|x|) feeds both the sigmoid and the stable-BCE log1p term.
    e = jnp.exp(-jnp.abs(x))                      # in (0, 1], never overflows
    inv = pl.reciprocal(1.0 + e, approx=False)    # exact: kernel is mem-bound
    pred = jnp.where(x >= 0, inv, e * inv)        # sigmoid(x)

    # fma-friendly forms (identical algebra to the two 4-op blends):
    #   t*a + (1-t)*(1-a) == (1-a) + t*(2a-1)
    #   t*(1-p) + (1-t)*p == p + t*(1-2p)
    alpha_w = (1.0 - alpha) + t * (2.0 * alpha - 1.0)
    pt = pred + t * (1.0 - 2.0 * pred)

    if gamma == 2.0:                       # fast path: no exp(g*log(pt)) pair
        pt_pow = pt * pt
    elif float(gamma).is_integer() and gamma >= 0:
        pt_pow = pt ** int(gamma)
    else:
        pt_pow = jnp.power(pt, gamma)

    # stable sigmoid_cross_entropy_with_logits: max(x,0) - x*z + log1p(exp(-|x|))
    bce = jnp.maximum(x, 0.0) - x * t + jnp.log1p(e)

    o_ref[...] = (alpha_w * pt_pow * bce * w).astype(o_ref.dtype)


def _pick_block_rows():
    """Per-chip block sizing (rows of a 128-lane f32 slab) + optional vmem limit."""
    try:
        vmem = getattr(pltpu.get_tpu_info(), "vmem_capacity_bytes", None)
    except Exception:  # non-TPU backend / query unavailable: stay conservative
        vmem = None
    if vmem is not None and vmem <= (64 << 20):
        # v7x-class: 4 MiB blocks amortize the ~0.35us/step overhead at 3.2 TB/s;
        # (3 in + 1 out) * 2 bufs * <=4 MiB = 32 MiB, so raise the scoped limit.
        return 8192, 48 << 20
    # v5e/v6e: 1 MiB blocks (~85% of roofline) fit the 16 MiB scoped default.
    return 2048, None


def sigmoid_focal_loss(logits, targets, weights, *, gamma=GAMMA, alpha=ALPHA):
    """logits/targets: (B, P, 1) float; weights: (B, P) float. Returns (B, P)."""
    assert logits.shape == targets.shape
    B, P, C = logits.shape
    assert C == 1, "kernel mirrors the C==1 path implied by the squeeze/ndim assert"
    assert weights.shape == (B, P)

    N = B * P
    x = logits.reshape(N)
    t = targets.reshape(N)
    w = weights.reshape(N)

    # Lane-dense slab. Common case (N % 128 == 0): pure re-view, no extra HBM
    # traffic. Ragged case: pad flat arrays (zero weight on the tail) + slice.
    ragged = (N % _LANE) != 0
    rows = pl.cdiv(N, _LANE)
    if ragged:
        pad = rows * _LANE - N
        x = jnp.pad(x, (0, pad))
        t = jnp.pad(t, (0, pad))
        w = jnp.pad(w, (0, pad))
    x2 = x.reshape(rows, _LANE)
    t2 = t.reshape(rows, _LANE)
    w2 = w.reshape(rows, _LANE)

    max_block_rows, vmem_limit = _pick_block_rows()
    if rows <= max_block_rows:
        block_rows, grid = rows, 1          # single full-array block
    else:
        block_rows = max_block_rows         # ragged final block masked by Pallas
        grid = pl.cdiv(rows, block_rows)

    spec = pl.BlockSpec((block_rows, _LANE), lambda i: (i, 0))
    elems = rows * _LANE
    out_dtype = logits.dtype
    cost = pl.CostEstimate(
        flops=18 * elems,
        transcendentals=2 * elems,
        bytes_accessed=(x2.size * x2.dtype.itemsize
                        + t2.size * t2.dtype.itemsize
                        + w2.size * w2.dtype.itemsize
                        + elems * jnp.dtype(out_dtype).itemsize),
    )
    cp_kwargs = dict(dimension_semantics=("parallel",))
    if vmem_limit is not None:
        cp_kwargs["vmem_limit_bytes"] = vmem_limit

    out = pl.pallas_call(
        functools.partial(_focal_loss_kernel, gamma=gamma, alpha=alpha),
        out_shape=jax.ShapeDtypeStruct((rows, _LANE), out_dtype),
        grid=(grid,),
        in_specs=[spec, spec, spec],
        out_specs=spec,
        cost_estimate=cost,
        compiler_params=pltpu.CompilerParams(**cp_kwargs),
    )(x2, t2, w2)

    if ragged:
        return out.reshape(-1)[:N].reshape(B, P)
    return out.reshape(B, P)


def _reference(logits, targets, weights, gamma=GAMMA, alpha=ALPHA):
    x = logits.astype(jnp.float32)
    t = targets.astype(jnp.float32)
    pred = jax.nn.sigmoid(x)
    alpha_w = t * alpha + (1.0 - t) * (1.0 - alpha)
    pt = t * (1.0 - pred) + (1.0 - t) * pred
    focal_w = alpha_w * jnp.power(pt, gamma)
    bce = (jnp.maximum(x, 0.0) - x * t + jnp.log1p(jnp.exp(-jnp.abs(x))))
    return (focal_w * bce).squeeze(-1) * weights.astype(jnp.float32)


def _check(B, P, key, target_dtype=jnp.float32):
    k1, k2, k3 = jax.random.split(key, 3)
    logits = jax.random.normal(k1, (B, P, 1), dtype=jnp.float32) * 3.0
    targets = (jax.random.uniform(k2, (B, P, 1)) > 0.7).astype(target_dtype)
    weights = jax.random.uniform(k3, (B, P), dtype=jnp.float32)

    out = jax.block_until_ready(sigmoid_focal_loss(logits, targets, weights))
    ref = _reference(logits, targets, weights)

    assert out.shape == (B, P)
    err = jnp.max(jnp.abs(out - ref))
    assert jnp.allclose(out, ref, atol=1e-5, rtol=1e-4), (
        f"mismatch vs reference (max abs diff {err})")


if __name__ == "__main__":
    key = jax.random.PRNGKey(0)
    ka, kb, kc = jax.random.split(key, 3)

    _check(2, 512, ka)                              # N % 128 == 0: zero-copy path
    _check(2, 1000, kb)                             # ragged path: pad + slice fallback
    _check(2, 512, kc, target_dtype=jnp.bfloat16)   # narrow one-hot targets (lossless)

    print("KERNEL_OK")
</pallas_src>

<mosaic_0001>
module attributes {stable_mosaic.version = 11 : i64} {
  func.func @_focal_loss_kernel(%arg0: i32, %arg1: memref<8x128xf32, #tpu.memory_space<vmem>>, %arg2: memref<8x128xf32, #tpu.memory_space<vmem>>, %arg3: memref<8x128xf32, #tpu.memory_space<vmem>>, %arg4: memref<8x128xf32, #tpu.memory_space<vmem>>) attributes {dimension_semantics = [#tpu.dimension_semantics<parallel>], iteration_bounds = array<i64: 1>, scalar_prefetch = 0 : i64, scratch_operands = 0 : i64, tpu.core_type = #tpu.core_type<tc>, window_params = [{transform_indices = @transform_0, window_bounds = array<i64: 8, 128>}, {transform_indices = @transform_1, window_bounds = array<i64: 8, 128>}, {transform_indices = @transform_2, window_bounds = array<i64: 8, 128>}, {transform_indices = @transform_3, window_bounds = array<i64: 8, 128>}]} {
    %c0 = arith.constant 0 : index
    %c0_0 = arith.constant 0 : index
    %0 = vector.load %arg1[%c0, %c0_0] : memref<8x128xf32, #tpu.memory_space<vmem>>, vector<8x128xf32>
    %c0_1 = arith.constant 0 : index
    %c0_2 = arith.constant 0 : index
    %1 = vector.load %arg2[%c0_1, %c0_2] : memref<8x128xf32, #tpu.memory_space<vmem>>, vector<8x128xf32>
    %c0_3 = arith.constant 0 : index
    %c0_4 = arith.constant 0 : index
    %2 = vector.load %arg3[%c0_3, %c0_4] : memref<8x128xf32, #tpu.memory_space<vmem>>, vector<8x128xf32>
    %3 = math.absf %0 : vector<8x128xf32>
    %cst = arith.constant 0.000000e+00 : f32
    %4 = vector.broadcast %cst : f32 to vector<8x128xf32>
    %5 = arith.subf %4, %3 : vector<8x128xf32>
    %6 = math.exp %5 : vector<8x128xf32>
    %cst_5 = arith.constant 1.000000e+00 : f32
    %7 = vector.broadcast %cst_5 : f32 to vector<8x128xf32>
    %8 = arith.addf %7, %6 : vector<8x128xf32>
    %9 = tpu.reciprocal %8 : vector<8x128xf32> -> vector<8x128xf32>
    %cst_6 = arith.constant 0.000000e+00 : f32
    %10 = vector.broadcast %cst_6 : f32 to vector<8x128xf32>
    %11 = arith.cmpf oge, %0, %10 : vector<8x128xf32>
    %12 = arith.mulf %6, %9 : vector<8x128xf32>
    %13 = arith.select %11, %9, %12 : vector<8x128xi1>, vector<8x128xf32>
    %cst_7 = arith.constant -5.000000e-01 : f32
    %14 = vector.broadcast %cst_7 : f32 to vector<8x128xf32>
    %15 = arith.mulf %1, %14 : vector<8x128xf32>
    %cst_8 = arith.constant 7.500000e-01 : f32
    %16 = vector.broadcast %cst_8 : f32 to vector<8x128xf32>
    %17 = arith.addf %16, %15 : vector<8x128xf32>
    %cst_9 = arith.constant 2.000000e+00 : f32
    %18 = vector.broadcast %cst_9 : f32 to vector<8x128xf32>
    %19 = arith.mulf %18, %13 : vector<8x128xf32>
    %cst_10 = arith.constant 1.000000e+00 : f32
    %20 = vector.broadcast %cst_10 : f32 to vector<8x128xf32>
    %21 = arith.subf %20, %19 : vector<8x128xf32>
    %22 = arith.mulf %1, %21 : vector<8x128xf32>
    %23 = arith.addf %13, %22 : vector<8x128xf32>
    %24 = arith.mulf %23, %23 : vector<8x128xf32>
    %cst_11 = arith.constant 0.000000e+00 : f32
    %25 = vector.broadcast %cst_11 : f32 to vector<8x128xf32>
    %26 = arith.maximumf %0, %25 : vector<8x128xf32>
    %27 = arith.mulf %0, %1 : vector<8x128xf32>
    %28 = arith.subf %26, %27 : vector<8x128xf32>
    %29 = math.log1p %6 : vector<8x128xf32>
    %30 = arith.addf %28, %29 : vector<8x128xf32>
    %31 = arith.mulf %17, %24 : vector<8x128xf32>
    %32 = arith.mulf %31, %30 : vector<8x128xf32>
    %33 = arith.mulf %32, %2 : vector<8x128xf32>
    %c0_12 = arith.constant 0 : index
    %c0_13 = arith.constant 0 : index
    %34 = vector.load %arg4[%c0_12, %c0_13] : memref<8x128xf32, #tpu.memory_space<vmem>>, vector<8x128xf32>
    tpu.vector_store %arg4[%c0_12, %c0_13], %33 {strides = array<i32>} : memref<8x128xf32, #tpu.memory_space<vmem>>, vector<8x128xf32>,
    return
  }
  func.func @transform_0(%arg0: i32) -> (i32, i32) {
    %c0_i32 = arith.constant 0 : i32
    %c0_i32_0 = arith.constant 0 : i32
    return %arg0, %c0_i32 : i32, i32
  }
  func.func @transform_1(%arg0: i32) -> (i32, i32) {
    %c0_i32 = arith.constant 0 : i32
    %c0_i32_0 = arith.constant 0 : i32
    return %arg0, %c0_i32 : i32, i32
  }
  func.func @transform_2(%arg0: i32) -> (i32, i32) {
    %c0_i32 = arith.constant 0 : i32
    %c0_i32_0 = arith.constant 0 : i32
    return %arg0, %c0_i32 : i32, i32
  }
  func.func @transform_3(%arg0: i32) -> (i32, i32) {
    %c0_i32 = arith.constant 0 : i32
    %c0_i32_0 = arith.constant 0 : i32
    return %arg0, %c0_i32 : i32, i32
  }
}

</mosaic_0001>

<bundles_post_ra>
// kernel: tpu_custom_call.1
= control target key start
LH: loop header
LB: loop body
LE: loop exit
PB: predicated region body
PF: predicated region fallthrough
CT: control target
= control target key end

     0   :  { %8 = vsyncpa [#allocation3], 0  ;;  %s278_s0 = inlined_call_operand.hbm [shape: f32[8,128], index: 0, kind: input, shape index: {}]   ;;  %s279_s1 = inlined_call_operand.hbm [shape: f32[8,128], index: 1, kind: input, shape index: {}]   ;;  %s280_s2 = inlined_call_operand.hbm [shape: f32[8,128], index: 2, kind: input, shape index: {}]   ;;  %s281_s3 = inlined_call_operand.hbm [shape: f32[8,128], index: 3, kind: output, shape index: {}]  }
   0x1   :  { %9 = vsyncpa [#allocation6], 0 }
   0x2   :  { %10 = vsyncpa [#allocation4], 0  ;;  %s206_s12 = smov [#allocation5]   ;;  %s207_s14 = smov [#allocation2]  }
   0x3   :  { %s27_s13 = sshll.u32 %s206_s12, 4  ;;  %s17_s15 = sshll.u32 %s207_s14, 4  ;;  %s28_s13 = int_to_ptr.vmem [resolvable:$true] %s27_s13  ;;  %s18_s15 = int_to_ptr.vmem [resolvable:$true] %s17_s15 }
   0x4   :  { %s112_s18 = scalar_lea.hbm %s279_s1, 128 }
   0x5   :  { %p113_p0 = scmp.ne.s32.totalorder %s279_s1, %s112_s18  ;;  %p116_p1 = scmp.lt.u32.totalorder %s112_s18, %s279_s1 }
   0x7   :  { %p118_p2 = pnand %p116_p1, %p113_p0 }
   0x9   :  { %121 = shalt.err (!%p118_p2)
}
   0xa   :  { %s122_s23 = scalar_lea.vmem %s28_s13, 128  ;;  %p127_p4 = scmp.lt.s32.totalorder %s28_s13, %s28_s13 }
   0xb   :  { %p123_p3 = scmp.ne.s32.totalorder %s28_s13, %s122_s23  ;;  %p128_p5 = scmp.lt.s32.totalorder %s122_s23, %s122_s23 }
   0xd   :  { %p129_p6 = por %p128_p5, %p127_p4 }
   0xf   :  { %p130_p7 = pnand %p129_p6, %p123_p3 }
  0x11   :  { %133 = shalt.err (!%p130_p7)
}
  0x12   :  { %30 = dma.hbm_to_vmem [thread:$0]  %s279_s1, 128, %s28_s13, [#allocation6]  }
  0x13   :  { %s134_s28 = scalar_lea.hbm %s278_s0, 128 }
  0x14   :  { %p135_p8 = scmp.ne.s32.totalorder %s278_s0, %s134_s28  ;;  %p138_p9 = scmp.lt.u32.totalorder %s134_s28, %s278_s0 }
  0x16   :  { %p140_p10 = pnand %p138_p9, %p135_p8 }
  0x18   :  { %143 = shalt.err (!%p140_p10)
}
  0x19   :  { %s144_s6 = scalar_lea.vmem %s18_s15, 128  ;;  %p149_p12 = scmp.lt.s32.totalorder %s18_s15, %s18_s15 }
  0x1a   :  { %p145_p11 = scmp.ne.s32.totalorder %s18_s15, %s144_s6  ;;  %p150_p13 = scmp.lt.s32.totalorder %s144_s6, %s144_s6 }
  0x1c   :  { %p151_p0 = por %p150_p13, %p149_p12 }
  0x1e   :  { %p152_p1 = pnand %p151_p0, %p145_p11 }
  0x20   :  { %155 = shalt.err (!%p152_p1)
}
  0x21   :  { %20 = dma.hbm_to_vmem [thread:$0]  %s278_s0, 128, %s18_s15, [#allocation3]  }
  0x22   :  { %s208_s8 = smov [#allocation7]   ;;  %s156_s12 = scalar_lea.hbm %s280_s2, 128 }
  0x23   :  { %s37_s9 = sshll.u32 %s208_s8, 4  ;;  %p157_p2 = scmp.ne.s32.totalorder %s280_s2, %s156_s12  ;;  %s38_s9 = int_to_ptr.vmem [resolvable:$true] %s37_s9 }
  0x24   :  { %p160_p3 = scmp.lt.u32.totalorder %s156_s12, %s280_s2 }
  0x26   :  { %p162_p4 = pnand %p160_p3, %p157_p2 }
  0x28   :  { %165 = shalt.err (!%p162_p4)
}
  0x29   :  { %s166_s18 = scalar_lea.vmem %s38_s9, 128  ;;  %p171_p6 = scmp.lt.s32.totalorder %s38_s9, %s38_s9 }
  0x2a   :  { %p167_p5 = scmp.ne.s32.totalorder %s38_s9, %s166_s18  ;;  %p172_p7 = scmp.lt.s32.totalorder %s166_s18, %s166_s18 }
  0x2c   :  { %p173_p8 = por %p172_p7, %p171_p6 }
  0x2e   :  { %p174_p9 = pnand %p173_p8, %p167_p5 }
  0x30   :  { %177 = shalt.err (!%p174_p9)
}
  0x31   :  { %40 = dma.hbm_to_vmem [thread:$0]  %s280_s2, 128, %s38_s9, [#allocation6]  }
  0x32   :  { %200 = dma.done.wait [#allocation3], 128  }
  0x33   :  { %201 = vsyncadd [#allocation3], 4294967168 }
  0x34   :  { %202 = dma.done.wait [#allocation6], 256  }
  0x35   :  { %203 = vsyncadd [#allocation6], 4294967040  ;;  %v50_v0 = vld [vmem:[#allocation2] sm:$0xff]  ;;  %v51_v12 = vld [vmem:[#allocation5] sm:$0xff]  ;;  %s209_s2 = smov [#allocation8]  }
  0x36   :  { %v53_v1 = vand.u32 2147483647, %v50_v0  ;;  %vm59_vm0 = vcmp.ge.f32.partialorder %v50_v0, 0.0  ;;  %v69_v15 = vmax.f32 %v50_v0, 0.0  ;;  %v70_v16 = vmul.f32 %v51_v12, %v50_v0  ;;  %v52_v29 = vld [vmem:[#allocation7] sm:$0xff]  ;;  %s92_s19 = sshll.u32 %s209_s2, 4  ;;  %s93_s19 = int_to_ptr.vmem [resolvable:$true] %s92_s19 }
  0x37   :  { %v62_v19 = vmul.f32 -0.5, %v51_v12  ;;  %s178_s20 = scalar_lea.vmem %s93_s19, 128  ;;  %p183_p11 = scmp.lt.s32.totalorder %s93_s19, %s93_s19 }
  0x38   :  { %v54_v2 = vsub.f32 0.0, %v53_v1  ;;  %v71_v22 = vsub.f32 %v69_v15, %v70_v16  ;;  %p179_p10 = scmp.ne.s32.totalorder %s93_s19, %s178_s20  ;;  %p184_p12 = scmp.lt.s32.totalorder %s178_s20, %s178_s20 }
  0x39   :  { %v63_v24 = vadd.f32 0.75, %v62_v19 }
  0x3a   :  { %v55_v3 = vmul.f32 1.442695, %v54_v2  ;;  %p185_p13 = por %p184_p12, %p183_p11 }
  0x3c   :  { %106 = vpow2.f32 %v55_v3  ;;  %p186_p0 = pnand %p185_p13, %p179_p10 }
  0x46   :  { %v107_v4 = vpop.eup %106 }
  0x47   :  { %v57_v5 = vadd.f32 1.0, %v107_v4  ;;  %v75_v6 = vmul.f32 -0.5, %v107_v4  ;;  %v78_v11 = vand.u32 2147483647, %v107_v4 }
  0x49   :  { %108 = vrcp.f32 %v57_v5  ;;  %v76_v9 = vadd.f32 1.0, %v75_v6  ;;  %vm79_vm1 = vcmp.lt.f32.partialorder %v78_v11, 0.0004427343 }
  0x4a   :  { %110 = vlog2.f32 %v57_v5 }
  0x4b   :  { %v77_v18 = vmul.f32 %v107_v4, %v76_v9 }
  0x53   :  { %v109_v7 = vpop.eup %108 }
  0x54   :  { %v60_v8 = vmul.f32 %v109_v7, %v107_v4  ;;  %v111_v10 = vpop.eup %110 }
  0x55   :  { %v74_v17 = vmul.f32 0.6931472, %v111_v10 }
  0x56   :  { %v61_v13 = vsel %vm59_vm0, %v109_v7, %v60_v8 }
  0x57   :  { %v64_v14 = vmul.f32 2.0, %v61_v13  ;;  %v80_v23 = vsel %vm79_vm1, %v77_v18, %v74_v17 }
  0x58   :  { %v81_v27 = vadd.f32 %v80_v23, %v71_v22 }
  0x59   :  { %v65_v20 = vsub.f32 1.0, %v64_v14 }
  0x5b   :  { %v66_v21 = vmul.f32 %v65_v20, %v51_v12 }
  0x5d   :  { %v67_v25 = vadd.f32 %v66_v21, %v61_v13 }
  0x5f   :  { %v68_v26 = vmul.f32 %v67_v25, %v67_v25 }
  0x61   :  { %v82_v28 = vmul.f32 %v68_v26, %v63_v24 }
  0x63   :  { %v83_v30 = vmul.f32 %v82_v28, %v81_v27 }
  0x65   :  { %v84_v31 = vmul.f32 %v83_v30, %v52_v29 }
  0x67   :  { %85 = vst [vmem:[#allocation8] sm:$0xff] %v84_v31 }
  0x68   :  { %189 = shalt.err (!%p186_p0)
}
  0x69   :  { %s190_s23 = scalar_lea.hbm %s281_s3, 128 }
  0x6a   :  { %p191_p1 = scmp.ne.s32.totalorder %s281_s3, %s190_s23  ;;  %p194_p2 = scmp.lt.u32.totalorder %s190_s23, %s281_s3 }
  0x6c   :  { %p196_p3 = pnand %p194_p2, %p191_p1 }
  0x6e   :  { %199 = shalt.err (!%p196_p3)
}
  0x6f   :  { %95 = dma.vmem_to_hbm [thread:$0]  %s93_s19, 128, %s281_s3, [#allocation4]  }
  0x70   :  { %204 = dma.done.wait [#allocation4], 128  }
  0x71   :  { %205 = vsyncadd [#allocation4], 4294967168 }
  0x72   :  { %99 = vsyncpa [#allocation3], 1 }
  0x73   :  { %100 = vsyncpa [#allocation6], 1 }
  0x74   :  { %101 = vsyncpa [#allocation4], 1 }

</bundles_post_ra>
